<compile_context>
chip_gen: v6e
topology: v6e:2x2x1
jax: 0.10.0
libtpu: 0.0.40
codegen_flags: <defaults>
</compile_context>

<pallas_src>
import functools

import jax
import jax.numpy as jnp
from jax.experimental import pallas as pl
from jax.experimental.pallas import tpu as pltpu


# ----------------------------- Pallas kernel ---------------------------------
def _expert_kernel(*refs, B_blk, T, H, causal):
    if causal:
        x_ref, keep_ref, w_ref, vecs_ref, o_ref = refs
        am = None
    else:
        x_ref, am_ref, keep_ref, w_ref, vecs_ref, o_ref = refs
        am = am_ref[...]                                 # (T, T) additive f32

    BT = B_blk * T
    scale = 1.0 / (float(H) ** 0.5)                      # 1 head => head_dim = H

    x_bf = x_ref[0].reshape(BT, H)                       # (BT, H) bf16, straight from HBM
    x = x_bf.astype(jnp.float32)                         # f32 only for LN statistics

    vecs = vecs_ref[0]                                   # (10, H) f32
    ln1_g, ln1_b = vecs[0:1], vecs[1:2]
    bq, bk, bv, bo = vecs[2:3], vecs[3:4], vecs[4:5], vecs[5:6]
    ln2_g, ln2_b = vecs[6:7], vecs[7:8]
    b1, b2 = vecs[8:9], vecs[9:10]

    def layernorm(v, g, b):                              # LN over last dim, eps=1e-8, f32
        mu = jnp.mean(v, axis=-1, keepdims=True)
        var = jnp.mean((v - mu) ** 2, axis=-1, keepdims=True)
        return (v - mu) * jax.lax.rsqrt(var + 1e-8) * g + b

    # --- attention block (dropout is identity at inference) ---
    q_in = layernorm(x, ln1_g, ln1_b)                    # Q = LN1(x)  (BT, H) f32

    # Separate Q / K / V projections: bf16 operands, f32 accumulation.
    q = jnp.dot(q_in.astype(jnp.bfloat16), w_ref[0, 0],
                preferred_element_type=jnp.float32) + bq
    k = jnp.dot(x_bf, w_ref[0, 1], preferred_element_type=jnp.float32) + bk
    v = jnp.dot(x_bf, w_ref[0, 2], preferred_element_type=jnp.float32) + bv

    q3 = q.reshape(B_blk, T, H).astype(jnp.bfloat16)
    k3 = k.reshape(B_blk, T, H).astype(jnp.bfloat16)
    v3 = v.reshape(B_blk, T, H).astype(jnp.bfloat16)

    scores = jnp.einsum('btd,bsd->bts', q3, k3,
                        preferred_element_type=jnp.float32) * scale
    if causal:
        # Generate the causal additive mask in-kernel: zero HBM / VMEM cost.
        row = jax.lax.broadcasted_iota(jnp.int32, (T, T), 0)
        col = jax.lax.broadcasted_iota(jnp.int32, (T, T), 1)
        am = jnp.where(col > row, -1e9, 0.0).astype(jnp.float32)
    scores = scores + am[None, :, :]

    m = jnp.max(scores, axis=-1, keepdims=True)
    e = jnp.exp(scores - m)
    denom = jnp.sum(e, axis=-1, keepdims=True)
    attn = e * pl.reciprocal(denom, approx=True)         # divide on the EUP slot
    ctx = jnp.einsum('bts,bsd->btd', attn.astype(jnp.bfloat16), v3,
                     preferred_element_type=jnp.float32).reshape(BT, H)

    mha = jnp.dot(ctx.astype(jnp.bfloat16), w_ref[0, 3],
                  preferred_element_type=jnp.float32) + bo
    y = q_in + mha                                       # residual with Q (not x)

    # --- point-wise feed-forward block ---
    z = layernorm(y, ln2_g, ln2_b)
    h1 = jnp.maximum(jnp.dot(z.astype(jnp.bfloat16), w_ref[0, 4],
                             preferred_element_type=jnp.float32) + b1, 0.0)
    h2 = jnp.dot(h1.astype(jnp.bfloat16), w_ref[0, 5],
                 preferred_element_type=jnp.float32) + b2

    out = (h2 + z) * keep_ref[...].reshape(BT, 1)        # masked_fill(timeline_mask, 0)
    o_ref[0] = out.reshape(B_blk, T, H).astype(o_ref.dtype)


# --------------------------- batch-tile heuristic ------------------------------
def _pick_block_batch(B, T, H, budget_bytes=24 << 20):
    """Largest divisor of B whose per-step f32 working set (scores/exp tiles +
    row intermediates) fits the budget; prefer >= 2 batch tiles so the
    (expert, batch) grid load-balances v7x's two TensorCores."""
    divisors = [d for d in range(1, B + 1) if B % d == 0]
    fits = [d for d in divisors
            if 2 * d * T * T * 4 + 8 * d * T * H * 4 <= budget_bytes]
    if not fits:
        return 1
    multi = [d for d in fits if B // d >= 2]
    return max(multi) if multi else max(fits)


# ------------------------------ JAX wrapper -----------------------------------
def sa_inference_layer(seqs, timeline_mask_bool, attention_mask_bool, params,
                       *, block_batch=None, out_dtype=jnp.bfloat16):
    """seqs: (B, T, C, H) f32; timeline_mask_bool: (B, T) bool (True = padded);
    attention_mask_bool: (T, T) bool (True = disallowed) or None for the standard
    causal mask (generated in-kernel, no HBM traffic).
    Returns a list of C arrays of shape (B, T, H) in `out_dtype`."""
    B, T, C, H = seqs.shape
    causal = attention_mask_bool is None

    # Per-expert slab (C, B, T, H).  The bf16 downcast is folded into the transpose
    # pass, halving its HBM write.  Ideally the producer emits this layout directly.
    x = jnp.transpose(seqs, (2, 0, 1, 3)).astype(jnp.bfloat16)          # (C, B, T, H)

    keep = (1.0 - timeline_mask_bool.astype(jnp.float32))[..., None]    # (B, T, 1)

    # ---- pack per-expert parameters (weights pre-transposed, bf16 for the MXU) ----
    w_all = jnp.stack(
        [jnp.swapaxes(params["wq"], -1, -2),
         jnp.swapaxes(params["wk"], -1, -2),
         jnp.swapaxes(params["wv"], -1, -2),
         jnp.swapaxes(params["wo"], -1, -2),
         jnp.swapaxes(params["w1"], -1, -2),
         jnp.swapaxes(params["w2"], -1, -2)], axis=1).astype(jnp.bfloat16)  # (C, 6, H, H)
    vecs = jnp.stack(
        [params["ln1_g"], params["ln1_b"],
         params["bq"], params["bk"], params["bv"], params["bo"],
         params["ln2_g"], params["ln2_b"],
         params["b1"], params["b2"]], axis=1).astype(jnp.float32)           # (C, 10, H)

    bb = block_batch if block_batch is not None else _pick_block_batch(B, T, H)
    n_bt = B // bb
    kernel = functools.partial(_expert_kernel, B_blk=bb, T=T, H=H, causal=causal)

    in_specs = [pl.BlockSpec((1, bb, T, H), lambda i, j: (i, j, 0, 0))]     # x
    operands = [x]
    if not causal:
        am = jnp.where(attention_mask_bool, -1e9, 0.0).astype(jnp.float32)  # (T, T)
        in_specs.append(pl.BlockSpec((T, T), lambda i, j: (0, 0)))
        operands.append(am)
    in_specs += [
        pl.BlockSpec((bb, T, 1), lambda i, j: (j, 0, 0)),                   # keep mask
        pl.BlockSpec((1, 6, H, H), lambda i, j: (i, 0, 0, 0)),              # weights
        pl.BlockSpec((1, 10, H), lambda i, j: (i, 0, 0)),                   # LN + biases
    ]
    operands += [keep, w_all, vecs]

    # NOTE: for long-T production shapes, add Tq/Tk tiling with online softmax here
    # so (bb, T, T) scores never materialize (required to fit v7x's 64 MiB VMEM).
    out = pl.pallas_call(
        kernel,
        out_shape=jax.ShapeDtypeStruct((C, B, T, H), out_dtype),
        grid_spec=pltpu.PrefetchScalarGridSpec(
            num_scalar_prefetch=0,
            grid=(C, n_bt),
            in_specs=in_specs,
            out_specs=pl.BlockSpec((1, bb, T, H), lambda i, j: (i, j, 0, 0)),
        ),
        compiler_params=pltpu.CompilerParams(
            dimension_semantics=("parallel", "parallel"),
            vmem_limit_bytes=64 * 1024 * 1024,   # explicit (v5e default is only 16 MiB)
        ),
    )(*operands)

    return [out[i] for i in range(C)]            # list of (B, T, H), like PyTorch


# --------------------------- pure-JAX reference --------------------------------
def sa_inference_layer_ref(seqs, timeline_mask_bool, attention_mask_bool, params):
    B, T, C, H = seqs.shape
    x_all = jnp.transpose(seqs, (2, 0, 1, 3)).astype(jnp.float32)    # (C, B, T, H)
    am = jnp.where(attention_mask_bool, -1e9, 0.0).astype(jnp.float32)
    keep = 1.0 - timeline_mask_bool.astype(jnp.float32)[..., None]   # (B, T, 1)

    def ln(v, g, b):
        mu = v.mean(-1, keepdims=True)
        var = ((v - mu) ** 2).mean(-1, keepdims=True)
        return (v - mu) / jnp.sqrt(var + 1e-8) * g + b

    outs = []
    for i in range(C):
        x = x_all[i]
        qin = ln(x, params["ln1_g"][i], params["ln1_b"][i])
        q = qin @ params["wq"][i].T + params["bq"][i]
        k = x @ params["wk"][i].T + params["bk"][i]
        v = x @ params["wv"][i].T + params["bv"][i]
        s = jnp.einsum('btd,bsd->bts', q, k) / jnp.sqrt(jnp.float32(H)) + am
        a = jax.nn.softmax(s, axis=-1)
        ctx = jnp.einsum('bts,bsd->btd', a, v)
        mha = ctx @ params["wo"][i].T + params["bo"][i]
        y = qin + mha
        z = ln(y, params["ln2_g"][i], params["ln2_b"][i])
        h1 = jax.nn.relu(z @ params["w1"][i].T + params["b1"][i])
        h2 = h1 @ params["w2"][i].T + params["b2"][i]
        outs.append((h2 + z) * keep)
    return outs


# ------------------------------ parameter init ---------------------------------
def init_params(key, C, H):
    ks = jax.random.split(key, 12)

    def mat(k):
        return jax.random.normal(k, (C, H, H), jnp.float32) * 0.05

    def vec(k):
        return jax.random.normal(k, (C, H), jnp.float32) * 0.05

    return {
        # LayerNorms: PyTorch default gamma=1, beta=0
        "ln1_g": jnp.ones((C, H), jnp.float32),
        "ln1_b": jnp.zeros((C, H), jnp.float32),
        "ln2_g": jnp.ones((C, H), jnp.float32),
        "ln2_b": jnp.zeros((C, H), jnp.float32),
        # MultiheadAttention in_proj (split into q/k/v) and out_proj
        "wq": mat(ks[0]), "bq": vec(ks[1]),
        "wk": mat(ks[2]), "bk": vec(ks[3]),
        "wv": mat(ks[4]), "bv": vec(ks[5]),
        "wo": mat(ks[6]), "bo": vec(ks[7]),
        # PointWiseFeedForward 1x1 convs (== linear over H)
        "w1": mat(ks[8]), "b1": vec(ks[9]),
        "w2": mat(ks[10]), "b2": vec(ks[11]),
    }


# ---------------------------------- main ----------------------------------------
if __name__ == "__main__":
    B, T, C, H = 2, 8, 3, 32

    key = jax.random.PRNGKey(0)
    k_seq, k_par = jax.random.split(key)

    seqs = jax.random.normal(k_seq, (B, T, C, H), jnp.float32)

    # timeline mask: True = padded position (zeroed in output)
    timeline_mask = jnp.zeros((B, T), jnp.bool_).at[0, 0].set(True).at[1, :2].set(True)

    # causal attention mask: True = not allowed to attend (s > t)
    attention_mask = ~jnp.tril(jnp.ones((T, T), jnp.bool_))

    params = init_params(k_par, C, H)

    # attention_mask=None -> standard causal mask generated in-kernel (fast path);
    # the reference below uses the explicit mask, validating the in-kernel iota mask.
    fn = jax.jit(functools.partial(sa_inference_layer, attention_mask_bool=None))
    experts = jax.block_until_ready(fn(seqs, timeline_mask, params=params))

    refs = sa_inference_layer_ref(seqs, timeline_mask, attention_mask, params)

    assert len(experts) == C
    for e, r in zip(experts, refs):
        assert e.shape == (B, T, H)
        assert bool(jnp.all(jnp.isfinite(e.astype(jnp.float32))))
        # bf16 x / matmul operands / output with f32 accumulation & LN/softmax stats:
        # loose but meaningful tolerance vs. the f32 reference.
        assert float(jnp.max(jnp.abs(e - r))) < 6e-2
    # padded positions must be zeroed exactly
    assert bool(jnp.all(experts[0][0, 0] == 0.0))
    assert bool(jnp.all(experts[1][1, :2] == 0.0))

    print("KERNEL_OK")
</pallas_src>

<mosaic_0001>
module attributes {stable_mosaic.version = 11 : i64} {
  func.func @_expert_kernel(%arg0: i32, %arg1: i32, %arg2: memref<1x1x8x32xbf16, #tpu.memory_space<vmem>>, %arg3: memref<1x8x1xf32, #tpu.memory_space<vmem>>, %arg4: memref<1x6x32x32xbf16, #tpu.memory_space<vmem>>, %arg5: memref<1x10x32xf32, #tpu.memory_space<vmem>>, %arg6: memref<1x1x8x32xbf16, #tpu.memory_space<vmem>>) attributes {dimension_semantics = [#tpu.dimension_semantics<parallel>, #tpu.dimension_semantics<parallel>], iteration_bounds = array<i64: 3, 2>, scalar_prefetch = 0 : i64, scratch_operands = 0 : i64, tpu.core_type = #tpu.core_type<tc>, window_params = [{transform_indices = @transform_0, window_bounds = array<i64: 1, 1, 8, 32>}, {transform_indices = @transform_1, window_bounds = array<i64: 1, 8, 1>}, {transform_indices = @transform_2, window_bounds = array<i64: 1, 6, 32, 32>}, {transform_indices = @transform_3, window_bounds = array<i64: 1, 10, 32>}, {transform_indices = @transform_4, window_bounds = array<i64: 1, 1, 8, 32>}]} {
    %c0 = arith.constant 0 : index
    %c0_0 = arith.constant 0 : index
    %c0_1 = arith.constant 0 : index
    %c0_2 = arith.constant 0 : index
    %0 = vector.load %arg2[%c0, %c0_0, %c0_1, %c0_2] : memref<1x1x8x32xbf16, #tpu.memory_space<vmem>>, vector<1x1x8x32xbf16>
    %1 = vector.shape_cast %0 : vector<1x1x8x32xbf16> to vector<1x8x32xbf16>
    %2 = vector.shape_cast %1 : vector<1x8x32xbf16> to vector<8x32xbf16>
    %3 = arith.extf %2 : vector<8x32xbf16> to vector<8x32xf32>
    %c0_3 = arith.constant 0 : index
    %c0_4 = arith.constant 0 : index
    %c0_5 = arith.constant 0 : index
    %4 = vector.load %arg5[%c0_3, %c0_4, %c0_5] : memref<1x10x32xf32, #tpu.memory_space<vmem>>, vector<1x10x32xf32>
    %5 = vector.shape_cast %4 : vector<1x10x32xf32> to vector<10x32xf32>
    %6 = vector.extract_strided_slice %5 {offsets = [0, 0], sizes = [1, 32], strides = [1, 1]} : vector<10x32xf32> to vector<1x32xf32>
    %7 = vector.extract_strided_slice %5 {offsets = [1, 0], sizes = [1, 32], strides = [1, 1]} : vector<10x32xf32> to vector<1x32xf32>
    %8 = vector.extract_strided_slice %5 {offsets = [2, 0], sizes = [1, 32], strides = [1, 1]} : vector<10x32xf32> to vector<1x32xf32>
    %9 = vector.extract_strided_slice %5 {offsets = [3, 0], sizes = [1, 32], strides = [1, 1]} : vector<10x32xf32> to vector<1x32xf32>
    %10 = vector.extract_strided_slice %5 {offsets = [4, 0], sizes = [1, 32], strides = [1, 1]} : vector<10x32xf32> to vector<1x32xf32>
    %11 = vector.extract_strided_slice %5 {offsets = [5, 0], sizes = [1, 32], strides = [1, 1]} : vector<10x32xf32> to vector<1x32xf32>
    %12 = vector.extract_strided_slice %5 {offsets = [6, 0], sizes = [1, 32], strides = [1, 1]} : vector<10x32xf32> to vector<1x32xf32>
    %13 = vector.extract_strided_slice %5 {offsets = [7, 0], sizes = [1, 32], strides = [1, 1]} : vector<10x32xf32> to vector<1x32xf32>
    %14 = vector.extract_strided_slice %5 {offsets = [8, 0], sizes = [1, 32], strides = [1, 1]} : vector<10x32xf32> to vector<1x32xf32>
    %15 = vector.extract_strided_slice %5 {offsets = [9, 0], sizes = [1, 32], strides = [1, 1]} : vector<10x32xf32> to vector<1x32xf32>
    %cst = arith.constant dense<0.000000e+00> : vector<8xf32>
    %16 = vector.multi_reduction <add>, %3, %cst [1] : vector<8x32xf32> to vector<8xf32>
    %17 = vector.shape_cast %16 : vector<8xf32> to vector<8x1xf32>
    %cst_6 = arith.constant 3.200000e+01 : f32
    %18 = vector.broadcast %cst_6 : f32 to vector<8x1xf32>
    %19 = arith.divf %17, %18 : vector<8x1xf32>
    %20 = vector.broadcast %19 : vector<8x1xf32> to vector<8x32xf32>
    %21 = arith.subf %3, %20 : vector<8x32xf32>
    %22 = arith.mulf %21, %21 : vector<8x32xf32>
    %cst_7 = arith.constant dense<0.000000e+00> : vector<8xf32>
    %23 = vector.multi_reduction <add>, %22, %cst_7 [1] : vector<8x32xf32> to vector<8xf32>
    %24 = vector.shape_cast %23 : vector<8xf32> to vector<8x1xf32>
    %cst_8 = arith.constant 3.200000e+01 : f32
    %25 = vector.broadcast %cst_8 : f32 to vector<8x1xf32>
    %26 = arith.divf %24, %25 : vector<8x1xf32>
    %27 = vector.broadcast %19 : vector<8x1xf32> to vector<8x32xf32>
    %28 = arith.subf %3, %27 : vector<8x32xf32>
    %cst_9 = arith.constant 9.99999993E-9 : f32
    %29 = vector.broadcast %cst_9 : f32 to vector<8x1xf32>
    %30 = arith.addf %26, %29 : vector<8x1xf32>
    %31 = math.rsqrt %30 : vector<8x1xf32>
    %32 = vector.broadcast %31 : vector<8x1xf32> to vector<8x32xf32>
    %33 = arith.mulf %28, %32 : vector<8x32xf32>
    %34 = vector.broadcast %6 : vector<1x32xf32> to vector<8x32xf32>
    %35 = arith.mulf %33, %34 : vector<8x32xf32>
    %36 = vector.broadcast %7 : vector<1x32xf32> to vector<8x32xf32>
    %37 = arith.addf %35, %36 : vector<8x32xf32>
    %38 = arith.truncf %37 : vector<8x32xf32> to vector<8x32xbf16>
    %c0_10 = arith.constant 0 : index
    %c0_11 = arith.constant 0 : index
    %c0_12 = arith.constant 0 : index
    %c0_13 = arith.constant 0 : index
    %39 = vector.load %arg4[%c0_10, %c0_11, %c0_12, %c0_13] : memref<1x6x32x32xbf16, #tpu.memory_space<vmem>>, vector<1x1x32x32xbf16>
    %40 = vector.shape_cast %39 : vector<1x1x32x32xbf16> to vector<32x32xbf16>
    %cst_14 = arith.constant dense<0.000000e+00> : vector<8x32xf32>
    %41 = tpu.matmul %38, %40, %cst_14 {dimension_numbers = #tpu.dot_dimension_numbers<[1], [0], [0], [1], [0, 0, 1, 1], [], []>} : vector<8x32xbf16>, vector<32x32xbf16>, vector<8x32xf32> -> vector<8x32xf32>
    %42 = vector.broadcast %8 : vector<1x32xf32> to vector<8x32xf32>
    %43 = arith.addf %41, %42 : vector<8x32xf32>
    %c0_15 = arith.constant 0 : index
    %c1 = arith.constant 1 : index
    %c0_16 = arith.constant 0 : index
    %c0_17 = arith.constant 0 : index
    %44 = vector.load %arg4[%c0_15, %c1, %c0_16, %c0_17] : memref<1x6x32x32xbf16, #tpu.memory_space<vmem>>, vector<1x1x32x32xbf16>
    %45 = vector.shape_cast %44 : vector<1x1x32x32xbf16> to vector<32x32xbf16>
    %cst_18 = arith.constant dense<0.000000e+00> : vector<8x32xf32>
    %46 = tpu.matmul %2, %45, %cst_18 {dimension_numbers = #tpu.dot_dimension_numbers<[1], [0], [0], [1], [0, 0, 1, 1], [], []>} : vector<8x32xbf16>, vector<32x32xbf16>, vector<8x32xf32> -> vector<8x32xf32>
    %47 = vector.broadcast %9 : vector<1x32xf32> to vector<8x32xf32>
    %48 = arith.addf %46, %47 : vector<8x32xf32>
    %c0_19 = arith.constant 0 : index
    %c2 = arith.constant 2 : index
    %c0_20 = arith.constant 0 : index
    %c0_21 = arith.constant 0 : index
    %49 = vector.load %arg4[%c0_19, %c2, %c0_20, %c0_21] : memref<1x6x32x32xbf16, #tpu.memory_space<vmem>>, vector<1x1x32x32xbf16>
    %50 = vector.shape_cast %49 : vector<1x1x32x32xbf16> to vector<32x32xbf16>
    %cst_22 = arith.constant dense<0.000000e+00> : vector<8x32xf32>
    %51 = tpu.matmul %2, %50, %cst_22 {dimension_numbers = #tpu.dot_dimension_numbers<[1], [0], [0], [1], [0, 0, 1, 1], [], []>} : vector<8x32xbf16>, vector<32x32xbf16>, vector<8x32xf32> -> vector<8x32xf32>
    %52 = vector.broadcast %10 : vector<1x32xf32> to vector<8x32xf32>
    %53 = arith.addf %51, %52 : vector<8x32xf32>
    %54 = vector.shape_cast %43 : vector<8x32xf32> to vector<1x8x32xf32>
    %55 = arith.truncf %54 : vector<1x8x32xf32> to vector<1x8x32xbf16>
    %56 = vector.shape_cast %48 : vector<8x32xf32> to vector<1x8x32xf32>
    %57 = arith.truncf %56 : vector<1x8x32xf32> to vector<1x8x32xbf16>
    %58 = vector.shape_cast %53 : vector<8x32xf32> to vector<1x8x32xf32>
    %59 = arith.truncf %58 : vector<1x8x32xf32> to vector<1x8x32xbf16>
    "tpu.trace_start"() <{level = 10 : i32, message = "btd,bsd->bts"}> : () -> ()
    %cst_23 = arith.constant dense<0.000000e+00> : vector<1x8x8xf32>
    %60 = tpu.matmul %55, %57, %cst_23 {dimension_numbers = #tpu.dot_dimension_numbers<[2], [2], [1], [1], [0, 0, 0, 1, 1, 1], [0], [0]>} : vector<1x8x32xbf16>, vector<1x8x32xbf16>, vector<1x8x8xf32> -> vector<1x8x8xf32>
    "tpu.trace_stop"() : () -> ()
    %cst_24 = arith.constant 0.176776692 : f32
    %61 = vector.broadcast %cst_24 : f32 to vector<1x8x8xf32>
    %62 = arith.mulf %60, %61 : vector<1x8x8xf32>
    %63 = tpu.iota {dimensions = array<i32: 0>} : vector<8x8xi32>
    %64 = tpu.iota {dimensions = array<i32: 1>} : vector<8x8xi32>
    %65 = arith.cmpi sgt, %64, %63 : vector<8x8xi32>
    %cst_25 = arith.constant -1.000000e+09 : f32
    %cst_26 = arith.constant 0.000000e+00 : f32
    %66 = vector.broadcast %cst_25 : f32 to vector<8x8xf32>
    %67 = vector.broadcast %cst_26 : f32 to vector<8x8xf32>
    %68 = arith.select %65, %66, %67 : vector<8x8xi1>, vector<8x8xf32>
    %69 = vector.shape_cast %68 : vector<8x8xf32> to vector<1x8x8xf32>
    %70 = arith.addf %62, %69 : vector<1x8x8xf32>
    %cst_27 = arith.constant dense<0xFF800000> : vector<1x8xf32>
    %71 = vector.multi_reduction <maximumf>, %70, %cst_27 [2] : vector<1x8x8xf32> to vector<1x8xf32>
    %72 = vector.shape_cast %71 : vector<1x8xf32> to vector<1x8x1xf32>
    %73 = vector.broadcast %72 : vector<1x8x1xf32> to vector<1x8x8xf32>
    %74 = arith.subf %70, %73 : vector<1x8x8xf32>
    %75 = math.exp %74 : vector<1x8x8xf32>
    %cst_28 = arith.constant dense<0.000000e+00> : vector<1x8xf32>
    %76 = vector.multi_reduction <add>, %75, %cst_28 [2] : vector<1x8x8xf32> to vector<1x8xf32>
    %77 = vector.shape_cast %76 : vector<1x8xf32> to vector<1x8x1xf32>
    %78 = tpu.reciprocal %77 {approx = true} : vector<1x8x1xf32> -> vector<1x8x1xf32>
    %79 = vector.broadcast %78 : vector<1x8x1xf32> to vector<1x8x8xf32>
    %80 = arith.mulf %75, %79 : vector<1x8x8xf32>
    %81 = arith.truncf %80 : vector<1x8x8xf32> to vector<1x8x8xbf16>
    "tpu.trace_start"() <{level = 10 : i32, message = "bts,bsd->btd"}> : () -> ()
    %cst_29 = arith.constant dense<0.000000e+00> : vector<1x8x32xf32>
    %82 = tpu.matmul %81, %59, %cst_29 {dimension_numbers = #tpu.dot_dimension_numbers<[2], [1], [1], [2], [0, 0, 0, 1, 1, 2], [0], [0]>} : vector<1x8x8xbf16>, vector<1x8x32xbf16>, vector<1x8x32xf32> -> vector<1x8x32xf32>
    "tpu.trace_stop"() : () -> ()
    %83 = vector.shape_cast %82 : vector<1x8x32xf32> to vector<8x32xf32>
    %84 = arith.truncf %83 : vector<8x32xf32> to vector<8x32xbf16>
    %c0_30 = arith.constant 0 : index
    %c3 = arith.constant 3 : index
    %c0_31 = arith.constant 0 : index
    %c0_32 = arith.constant 0 : index
    %85 = vector.load %arg4[%c0_30, %c3, %c0_31, %c0_32] : memref<1x6x32x32xbf16, #tpu.memory_space<vmem>>, vector<1x1x32x32xbf16>
    %86 = vector.shape_cast %85 : vector<1x1x32x32xbf16> to vector<32x32xbf16>
    %cst_33 = arith.constant dense<0.000000e+00> : vector<8x32xf32>
    %87 = tpu.matmul %84, %86, %cst_33 {dimension_numbers = #tpu.dot_dimension_numbers<[1], [0], [0], [1], [0, 0, 1, 1], [], []>} : vector<8x32xbf16>, vector<32x32xbf16>, vector<8x32xf32> -> vector<8x32xf32>
    %88 = vector.broadcast %11 : vector<1x32xf32> to vector<8x32xf32>
    %89 = arith.addf %87, %88 : vector<8x32xf32>
    %90 = arith.addf %37, %89 : vector<8x32xf32>
    %cst_34 = arith.constant dense<0.000000e+00> : vector<8xf32>
    %91 = vector.multi_reduction <add>, %90, %cst_34 [1] : vector<8x32xf32> to vector<8xf32>
    %92 = vector.shape_cast %91 : vector<8xf32> to vector<8x1xf32>
    %cst_35 = arith.constant 3.200000e+01 : f32
    %93 = vector.broadcast %cst_35 : f32 to vector<8x1xf32>
    %94 = arith.divf %92, %93 : vector<8x1xf32>
    %95 = vector.broadcast %94 : vector<8x1xf32> to vector<8x32xf32>
    %96 = arith.subf %90, %95 : vector<8x32xf32>
    %97 = arith.mulf %96, %96 : vector<8x32xf32>
    %cst_36 = arith.constant dense<0.000000e+00> : vector<8xf32>
    %98 = vector.multi_reduction <add>, %97, %cst_36 [1] : vector<8x32xf32> to vector<8xf32>
    %99 = vector.shape_cast %98 : vector<8xf32> to vector<8x1xf32>
    %cst_37 = arith.constant 3.200000e+01 : f32
    %100 = vector.broadcast %cst_37 : f32 to vector<8x1xf32>
    %101 = arith.divf %99, %100 : vector<8x1xf32>
    %102 = vector.broadcast %94 : vector<8x1xf32> to vector<8x32xf32>
    %103 = arith.subf %90, %102 : vector<8x32xf32>
    %cst_38 = arith.constant 9.99999993E-9 : f32
    %104 = vector.broadcast %cst_38 : f32 to vector<8x1xf32>
    %105 = arith.addf %101, %104 : vector<8x1xf32>
    %106 = math.rsqrt %105 : vector<8x1xf32>
    %107 = vector.broadcast %106 : vector<8x1xf32> to vector<8x32xf32>
    %108 = arith.mulf %103, %107 : vector<8x32xf32>
    %109 = vector.broadcast %12 : vector<1x32xf32> to vector<8x32xf32>
    %110 = arith.mulf %108, %109 : vector<8x32xf32>
    %111 = vector.broadcast %13 : vector<1x32xf32> to vector<8x32xf32>
    %112 = arith.addf %110, %111 : vector<8x32xf32>
    %113 = arith.truncf %112 : vector<8x32xf32> to vector<8x32xbf16>
    %c0_39 = arith.constant 0 : index
    %c4 = arith.constant 4 : index
    %c0_40 = arith.constant 0 : index
    %c0_41 = arith.constant 0 : index
    %114 = vector.load %arg4[%c0_39, %c4, %c0_40, %c0_41] : memref<1x6x32x32xbf16, #tpu.memory_space<vmem>>, vector<1x1x32x32xbf16>
    %115 = vector.shape_cast %114 : vector<1x1x32x32xbf16> to vector<32x32xbf16>
    %cst_42 = arith.constant dense<0.000000e+00> : vector<8x32xf32>
    %116 = tpu.matmul %113, %115, %cst_42 {dimension_numbers = #tpu.dot_dimension_numbers<[1], [0], [0], [1], [0, 0, 1, 1], [], []>} : vector<8x32xbf16>, vector<32x32xbf16>, vector<8x32xf32> -> vector<8x32xf32>
    %117 = vector.broadcast %14 : vector<1x32xf32> to vector<8x32xf32>
    %118 = arith.addf %116, %117 : vector<8x32xf32>
    %cst_43 = arith.constant 0.000000e+00 : f32
    %119 = vector.broadcast %cst_43 : f32 to vector<8x32xf32>
    %120 = arith.maximumf %118, %119 : vector<8x32xf32>
    %121 = arith.truncf %120 : vector<8x32xf32> to vector<8x32xbf16>
    %c0_44 = arith.constant 0 : index
    %c5 = arith.constant 5 : index
    %c0_45 = arith.constant 0 : index
    %c0_46 = arith.constant 0 : index
    %122 = vector.load %arg4[%c0_44, %c5, %c0_45, %c0_46] : memref<1x6x32x32xbf16, #tpu.memory_space<vmem>>, vector<1x1x32x32xbf16>
    %123 = vector.shape_cast %122 : vector<1x1x32x32xbf16> to vector<32x32xbf16>
    %cst_47 = arith.constant dense<0.000000e+00> : vector<8x32xf32>
    %124 = tpu.matmul %121, %123, %cst_47 {dimension_numbers = #tpu.dot_dimension_numbers<[1], [0], [0], [1], [0, 0, 1, 1], [], []>} : vector<8x32xbf16>, vector<32x32xbf16>, vector<8x32xf32> -> vector<8x32xf32>
    %125 = vector.broadcast %15 : vector<1x32xf32> to vector<8x32xf32>
    %126 = arith.addf %124, %125 : vector<8x32xf32>
    %127 = arith.addf %126, %112 : vector<8x32xf32>
    %c0_48 = arith.constant 0 : index
    %c0_49 = arith.constant 0 : index
    %c0_50 = arith.constant 0 : index
    %128 = vector.load %arg3[%c0_48, %c0_49, %c0_50] : memref<1x8x1xf32, #tpu.memory_space<vmem>>, vector<1x8x1xf32>
    %129 = vector.shape_cast %128 : vector<1x8x1xf32> to vector<8x1xf32>
    %130 = vector.broadcast %129 : vector<8x1xf32> to vector<8x32xf32>
    %131 = arith.mulf %127, %130 : vector<8x32xf32>
    %132 = vector.shape_cast %131 : vector<8x32xf32> to vector<1x8x32xf32>
    %133 = arith.truncf %132 : vector<1x8x32xf32> to vector<1x8x32xbf16>
    %c0_51 = arith.constant 0 : index
    %c0_52 = arith.constant 0 : index
    %c0_53 = arith.constant 0 : index
    %c0_54 = arith.constant 0 : index
    %134 = vector.load %arg6[%c0_51, %c0_52, %c0_53, %c0_54] : memref<1x1x8x32xbf16, #tpu.memory_space<vmem>>, vector<1x1x8x32xbf16>
    %135 = vector.shape_cast %134 : vector<1x1x8x32xbf16> to vector<1x8x32xbf16>
    %136 = vector.shape_cast %133 : vector<1x8x32xbf16> to vector<1x1x8x32xbf16>
    tpu.vector_store %arg6[%c0_51, %c0_52, %c0_53, %c0_54], %136 {strides = array<i32>} : memref<1x1x8x32xbf16, #tpu.memory_space<vmem>>, vector<1x1x8x32xbf16>,
    return
  }
  func.func @transform_0(%arg0: i32, %arg1: i32) -> (i32, i32, i32, i32) {
    %c0_i32 = arith.constant 0 : i32
    %c0_i32_0 = arith.constant 0 : i32
    %c0_i32_1 = arith.constant 0 : i32
    return %arg0, %arg1, %c0_i32, %c0_i32_0 : i32, i32, i32, i32
  }
  func.func @transform_1(%arg0: i32, %arg1: i32) -> (i32, i32, i32) {
    %c0_i32 = arith.constant 0 : i32
    %c0_i32_0 = arith.constant 0 : i32
    %c0_i32_1 = arith.constant 0 : i32
    return %arg1, %c0_i32, %c0_i32_0 : i32, i32, i32
  }
  func.func @transform_2(%arg0: i32, %arg1: i32) -> (i32, i32, i32, i32) {
    %c0_i32 = arith.constant 0 : i32
    %c0_i32_0 = arith.constant 0 : i32
    %c0_i32_1 = arith.constant 0 : i32
    %c0_i32_2 = arith.constant 0 : i32
    return %arg0, %c0_i32, %c0_i32_0, %c0_i32_1 : i32, i32, i32, i32
  }
  func.func @transform_3(%arg0: i32, %arg1: i32) -> (i32, i32, i32) {
    %c0_i32 = arith.constant 0 : i32
    %c0_i32_0 = arith.constant 0 : i32
    %c0_i32_1 = arith.constant 0 : i32
    return %arg0, %c0_i32, %c0_i32_0 : i32, i32, i32
  }
  func.func @transform_4(%arg0: i32, %arg1: i32) -> (i32, i32, i32, i32) {
    %c0_i32 = arith.constant 0 : i32
    %c0_i32_0 = arith.constant 0 : i32
    %c0_i32_1 = arith.constant 0 : i32
    return %arg0, %arg1, %c0_i32, %c0_i32_0 : i32, i32, i32, i32
  }
}

</mosaic_0001>

<bundles_post_ra>
// kernel: sa_inference_layer.1
= control target key start
LH: loop header
LB: loop body
LE: loop exit
PB: predicated region body
PF: predicated region fallthrough
CT: control target
= control target key end

     0   :  { %s1246_s15 = smov 0   ;;  %s1248_s16 = smov 0   ;;  %s1425_s0 = inlined_call_operand.vmem [shape: bf16[3,2,8,32], index: 0, kind: input, shape index: {}]   ;;  %s1426_s1 = inlined_call_operand.vmem [shape: f32[2,8,1], index: 1, kind: input, shape index: {}]   ;;  %s1427_s2 = inlined_call_operand.vmem [shape: bf16[3,6,32,32], index: 2, kind: input, shape index: {}]   ;;  %s1428_s3 = inlined_call_operand.vmem [shape: f32[3,10,32], index: 3, kind: input, shape index: {}]   ;;  %s1429_s4 = inlined_call_operand.vmem [shape: bf16[3,2,8,32], index: 4, kind: output, shape index: {}]  }
   0x1   :  { %s1250_s17 = smov 0   ;;  %s1252_s18 = smov 0  }
   0x2   :  { %s1254_s19 = smov 0  }
   0x3 LB: > { %s23_s20 = sadd.s32 1, %s1208_s17  ;;  %s26_s21 = sadd.s32 1, %s1212_s18  ;;  %s1216_s19 = sphi %s1254_s19, %s14_s19   ;;  %s1212_s18 = sphi %s1252_s18, %s1433_s18   ;;  %s1208_s17 = sphi %s1250_s17, %s1432_s17   ;;  %s1204_s16 = sphi %s1248_s16, %s1431_s16   ;;  %s1200_s15 = sphi %s1246_s15, %s1430_s15  }
   0x4   : > { %p24_p0 = scmp.ge.s32.totalorder %s23_s20, 2  ;;  %p979_p1 = scmp.ge.s32.totalorder %s1216_s19, 1 }
   0x5   : > { %p210_p2 = scmp.lt.s32.totalorder %s1216_s19, 7 }
   0x6   : > { %s1435_s20 = smov (%p24_p0, %s23_s20), 0  ;;  %s1437_s21 = smov (!%p24_p0, %s26_s21), %s1212_s18 }
   0x7   : > { %p211_p3 = pnand %p979_p1, %p210_p2  ;;  %p28_p4 = scmp.ge.s32.totalorder %s1437_s21, 3 }
   0x8   : > { %p256_p5 = scmp.lt.s32.totalorder (!%p211_p3), %s1204_s16, 2  ;;  %p258_p6 = scmp.lt.s32.totalorder (!%p211_p3), %s1200_s15, 1 }
   0x9   : > { %s1439_s21 = smov (%p28_p4, %s1437_s21), 0  ;;  %214 = sbr.rel (%p211_p3) target bundleno = 2143 (0x85f), region = 36 }
   0xe   : > { %s1441_s16 = smov (!%p256_p5, %s1204_s16), 2  ;;  %s1443_s15 = smov (!%p258_p6, %s1200_s15), 1  ;;  %vm291_vm0 = vcmask 261120   ;;  %v1218_v9 = vmov 0.0   ;;  %vm1219_vm1 = vmmov 0   ;;  %v306_v16 = vlaneseq }
   0xf   : > { %s980_s22 = sshll.u32 %s1441_s16, 1  ;;  %s1113_s23 = smul.u32 96, %s1441_s16  ;;  %1061 = vmatprep.subr.bf16.mxu1 %v1218_v9  ;;  %1053 = vmatprep.subr.bf16.mxu0 %v1218_v9  ;;  %vm562_vm3 = vcmask 64512   ;;  %vm578_vm4 = vcmask 1043456   ;;  %vm851_vm5 = vcmask 257024  }
  0x10   : > { %s1283_s24 = sadd.s32 %s980_s22, %s1443_s15  ;;  %1065 = vmatprep.mubr.msk.bf16.mxu1 %vm1219_vm1, %v1218_v9  ;;  %1057 = vmatprep.mubr.msk.bf16.mxu0 %vm1219_vm1, %v1218_v9  ;;  %s1030_s6 = sshll.u32 %s1441_s16, 4  ;;  %v1320_v17 = vshrl.u32 %v306_v16, 7  ;;  %v558_v47 = vand.u32 127, %v306_v16 }
  0x11   : > { %s981_s25 = sshll.u32 %s1283_s24, 2  ;;  %s1289_s28 = scalar_lea.vmem %s1427_s2, %s1113_s23 }
  0x12   : > { %s263_s5 = scalar_lea.vmem %s1425_s0, %s981_s25  ;;  %v1158_v8 = vld [vmem:[%s1289_s28 + $0x18] sm:$0xff]   ;;  %v1160_v10 = vld [vmem:[%s1289_s28 + $0x8] sm:$0xff]   ;;  %v1159_v11 = vld [vmem:[%s1289_s28 + $0x10] sm:$0xff]   ;;  %s1325_s9 = scalar_lea.vmem %s1428_s3, %s1030_s6  ;;  %v308_v18 = vsub.s32 0, %v1320_v17  ;;  %v313_v20 = vsub.s32 1, %v1320_v17  ;;  %v387_v28 = vsub.s32 3, %v1320_v17  ;;  %vm559_vm2 = vcmp.gt.s32.totalorder %v558_v47, %v1320_v17 }
  0x13   : > { %v1296_v0 = vld [vmem:[%s263_s5] sm:$0xf]  ;;  %1062 = vmatpush3.bf16.msra.mxu1 %v1158_v8  ;;  %1054 = vmatpush3.bf16.msra.mxu0 %v1160_v10  ;;  %v323_v37 = vsub.s32 2, %v1320_v17  ;;  %v1162_v45 = vld [vmem:[%s1289_s28 + $0x28] sm:$0xff]   ;;  %v560_v49 = vsel %vm559_vm2, -1e+09, %v1218_v9  ;;  %s285_s16 = scalar_lea.vmem %s1429_s4, %s981_s25 }
  0x14   : > { %v288_v1 = vunpack.c.l.bf16 %v1296_v0  ;;  %1063 = vmatprep.subr.bf16.mxu1 %v1218_v9  ;;  %v1161_v12 = vld [vmem:[%s1289_s28] sm:$0xff]   ;;  %1055 = vmatprep.subr.bf16.mxu0 %v1218_v9  ;;  %v451_v56 = vsub.s32 4, %v1320_v17  ;;  %s982_s10 = sshll.u32 %s1443_s15, 3 }
  0x15   : > { %v1329_v19 = vld [vmem:[%s1325_s9] sm:$0xff]  ;;  %s267_s13 = scalar_lea.vmem %s1426_s1, %s982_s10 }
  0x16   : > { %v292_v2 = vsel %vm291_vm0, %v288_v1, 0.0  ;;  %v309_v21 = vrot.slane %v1329_v19, %v308_v18  ;;  %v314_v24 = vrot.slane %v1329_v19, %v313_v20  ;;  %v388_v29 = vrot.slane %v1329_v19, %v387_v28  ;;  %v1163_v46 = vld [vmem:[%s1289_s28 + $0x20] sm:$0xff]  }
  0x17   : > { %293 = vadd.xlane.f32.xlu0 %v292_v2  ;;  %1064 = vmatpush3.bf16.msra.mxu1 %v1159_v11  ;;  %v324_v38 = vrot.slane %v1329_v19, %v323_v37  ;;  %v452_v57 = vrot.slane %v1329_v19, %v451_v56  ;;  %v1166_v37 = vld [vmem:[%s1289_s28 + $0x48] sm:$0xff]  }
  0x18   : > { %1056 = vmatpush3.bf16.msra.mxu0 %v1161_v12  ;;  %1077 = vmatprep.subr.bf16.mxu1 %v1218_v9 }
  0x19   : > { %1069 = vmatprep.subr.bf16.mxu0 %v1218_v9 }
  0x1a   : > { %1066 = vmatmul.mubr.msk.bf16.vlgmr.msra.gmra.mxu1 %vm291_vm0, %v1296_v0 }
  0x1b   : > { %1079 = vmatprep.mubr.msk.bf16.mxu1 %vm1219_vm1, %v1218_v9 }
  0xa0   : > { %v294_v3 = vpop.xlane.xlu0 %293 }
  0xa1   : > { %v296_v4 = vmul.f32 0.03125, %v294_v3 }
  0xa3   : > { %v297_v5 = vsub.f32 %v288_v1, %v296_v4 }
  0xa5   : > { %v298_v6 = vmul.f32 %v297_v5, %v297_v5 }
  0xa7   : > { %v299_v7 = vsel %vm291_vm0, %v298_v6, 0.0  ;;  %v1164_v6 = vld [vmem:[%s1289_s28 + $0x38] sm:$0xff]  }
  0xa8   : > { %300 = vadd.xlane.f32.xlu0 %v299_v7  ;;  %v1165_v7 = vld [vmem:[%s1289_s28 + $0x30] sm:$0xff]  }
  0xda   : > { %v438_v30 = vpop.f32.mrf.mxu1 }
  0xdb   : > { %v439_v31 = vadd.f32 %v438_v30, %v388_v29 }
  0xdc   : > { %v1067_v32 = vpop.f32.mrf.mxu1 }
  0xdd   : > { %v506_v33 = vpack.c.bf16 %v439_v31, %v439_v31 }
  0xde   : > { %v441_v34 = vpop.f32.mrf.mxu1 }
  0xdf   : > { %v512_v35 = vsel %vm291_vm0, %v506_v33, 0 }
  0xe0   : > { %v1068_v36 = vpop.f32.mrf.mxu1  ;;  %1078 = vmatpush3.bf16.xpose.msra.mxu1 %v512_v35 }
  0xe1   : > { %1089 = vmatprep.subr.bf16.mxu1 %v1218_v9 }
 0x131   : > { %v301_v13 = vpop.xlane.xlu0 %300 }
 0x132   : > { %v302_v14 = vmul.f32 0.03125, %v301_v13 }
 0x134   : > { %v303_v15 = vadd.f32 1e-08, %v302_v14 }
 0x136   : > { %1170 = vrsqrt.f32 %v303_v15 }
 0x143   : > { %v1171_v22 = vpop.eup %1170 }
 0x144   : > { %v305_v23 = vmul.f32 %v1171_v22, %v297_v5  ;;  %v630_v22 = vsub.s32 5, %v1320_v17 }
 0x146   : > { %v310_v25 = vmul.f32 %v309_v21, %v305_v23  ;;  %v631_v23 = vrot.slane %v1329_v19, %v630_v22 }
 0x148   : > { %v1338_v26 = vadd.f32 %v314_v24, %v310_v25 }
 0x14a   : > { %v316_v27 = vpack.c.bf16 %v1338_v26, %v1338_v26 }
 0x14c   : > { %1058 = vmatmul.mubr.msk.bf16.vlgmr.msra.gmra.mxu0 %vm291_vm0, %v316_v27 }
 0x14d   : > { %1073 = vmatprep.mubr.msk.bf16.mxu0 %vm1219_vm1, %v1218_v9  ;;  %1070 = vmatpush3.bf16.msra.mxu0 %v1162_v45 }
 0x14e   : > { %1071 = vmatprep.subr.bf16.mxu0 %v1218_v9 }
 0x151   : > { %1072 = vmatpush3.bf16.msra.mxu0 %v1163_v46 }
 0x152   : > { %1083 = vmatprep.subr.bf16.mxu0 %v1218_v9 }
 0x154   : > { %1074 = vmatmul.mubr.msk.bf16.vlgmr.msra.gmra.mxu0 %vm291_vm0, %v1296_v0 }
 0x155   : > { %1085 = vmatprep.mubr.msk.bf16.mxu0 %vm1219_vm1, %v1218_v9 }
 0x20c   : > { %v374_v39 = vpop.f32.mrf.mxu0 }
 0x20d   : > { %v375_v40 = vadd.f32 %v374_v39, %v324_v38  ;;  %v1167_v38 = vld [vmem:[%s1289_s28 + $0x40] sm:$0xff]  }
 0x20e   : > { %v1059_v41 = vpop.f32.mrf.mxu0 }
 0x20f   : > { %v505_v42 = vpack.c.bf16 %v375_v40, %v375_v40 }
 0x210   : > { %v377_v43 = vpop.f32.mrf.mxu0 }
 0x211   : > { %1080 = vmatmul.mubr.msk.bf16.vlgmr.msra.gmra.mxu1 %vm291_vm0, %v505_v42  ;;  %v703_v42 = vsub.s32 6, %v1320_v17  ;;  %v708_v43 = vsub.s32 7, %v1320_v17 }
 0x212   : > { %v1060_v44 = vpop.f32.mrf.mxu0  ;;  %1093 = vmatprep.mubr.msk.bf16.mxu1 %vm1219_vm1, %v1218_v9  ;;  %1090 = vmatpush3.bf16.msra.mxu1 %v1164_v6 }
 0x213   : > { %1091 = vmatprep.subr.bf16.mxu1 %v1218_v9  ;;  %v704_v44 = vrot.slane %v1329_v19, %v703_v42  ;;  %v709_v47 = vrot.slane %v1329_v19, %v708_v43 }
 0x214   : > { %v499_v58 = vpop.f32.mrf.mxu0 }
 0x215   : > { %v500_v59 = vadd.f32 %v499_v58, %v452_v57 }
 0x216   : > { %v1075_v60 = vpop.f32.mrf.mxu0  ;;  %1092 = vmatpush3.bf16.msra.mxu1 %v1165_v7 }
 0x217   : > { %v507_v61 = vpack.c.bf16 %v500_v59, %v500_v59  ;;  %1105 = vmatprep.subr.bf16.mxu1 %v1218_v9 }
 0x218   : > { %v502_v62 = vpop.f32.mrf.mxu0 }
 0x219   : > { %v580_v63 = vsel %vm578_vm4, %v507_v61, 0 }
 0x21a   : > { %v1076_v0 = vpop.f32.mrf.mxu0  ;;  %1084 = vmatpush3.bf16.msra.mxu0 %v580_v63 }
 0x21b   : > { %1097 = vmatprep.subr.bf16.mxu0 %v1218_v9 }
 0x2d1   : > { %v548_v48 = vpop.f32.mrf.mxu1 }
 0x2d2   : > { %v554_v50 = vmul.f32 0.17677669, %v548_v48 }
 0x2d3   : > { %v1081_v51 = vpop.f32.mrf.mxu1 }
 0x2d4   : > { %v561_v52 = vadd.f32 %v560_v49, %v554_v50  ;;  %v1220_v51 = vmov 0  }
 0x2d5   : > { %v551_v53 = vpop.f32.mrf.mxu1  ;;  %1157 = vset.pattern.permute.xlu0 %v1220_v51 }
 0x2d6   : > { %v563_v54 = vsel %vm562_vm3, %v561_v52, -inf  ;;  %v290_v53 = vld [vmem:[%s1325_s9 + $0x8] sm:$0x3] }
 0x2d7   : > { %564 = vmax.xlane.f32.xlu1 %v563_v54  ;;  %v1082_v55 = vpop.f32.mrf.mxu1  ;;  %v720_v19 = vrot.slane %v290_v53, %v308_v18  ;;  %v786_v61 = vrot.slane %v290_v53, %v313_v20 }
 0x360   : > { %v565_v1 = vpop.xlane.xlu1 %564 }
 0x361   : > { %v566_v2 = vsub.f32 %v561_v52, %v565_v1  ;;  %v843_v52 = vld [vmem:[%s267_s13] sm:$0xff] }
 0x363   : > { %v567_v3 = vmul.f32 1.442695, %v566_v2 }
 0x365   : > { %1172 = vpow2.f32 %v567_v3 }
 0x372   : > { %v1173_v4 = vpop.eup %1172 }
 0x373   : > { %v569_v5 = vsel %vm562_vm3, %v1173_v4, 0.0 }
 0x374   : > { %570 = vadd.xlane.f32.xlu1 %v569_v5 }
 0x3fd   : > { %v571_v8 = vpop.xlane.xlu1 %570 }
 0x3fe   : > { %1174 = vrcp.f32 %v571_v8 }
 0x40b   : > { %v1175_v10 = vpop.eup %1174 }
 0x40c   : > { %v573_v11 = vmul.f32 %v1175_v10, %v1173_v4 }
 0x40e   : > { %v574_v12 = vpack.c.bf16 %v573_v11, %v573_v11 }
 0x410   : > { %1086 = vmatmul.mubr.msk.bf16.vlgmr.msra.gmra.mxu0 %vm562_vm3, %v574_v12 }
 0x411   : > { %1101 = vmatprep.mubr.msk.bf16.mxu0 %vm1219_vm1, %v1218_v9  ;;  %1098 = vmatpush3.bf16.msra.mxu0 %v1166_v37 }
 0x412   : > { %1099 = vmatprep.subr.bf16.mxu0 %v1218_v9 }
 0x415   : > { %1100 = vmatpush3.bf16.msra.mxu0 %v1167_v38 }
 0x4d0   : > { %v616_v13 = vpop.f32.mrf.mxu0 }
 0x4d1   : > { %v622_v14 = vpack.c.bf16 %v616_v13, %v616_v13 }
 0x4d2   : > { %v1087_v15 = vpop.f32.mrf.mxu0 }
 0x4d3   : > { %1094 = vmatmul.mubr.msk.bf16.vlgmr.msra.gmra.mxu1 %vm291_vm0, %v622_v14 }
 0x4d4   : > { %v619_v16 = vpop.f32.mrf.mxu0  ;;  %1109 = vmatprep.mubr.msk.bf16.mxu1 %vm1219_vm1, %v1218_v9 }
 0x4d6   : > { %v1088_v21 = vpop.f32.mrf.mxu0 }
 0x593   : > { %v681_v24 = vpop.f32.mrf.mxu1 }
 0x594   : > { %v682_v25 = vadd.f32 %v681_v24, %v631_v23 }
 0x595   : > { %v1095_v27 = vpop.f32.mrf.mxu1 }
 0x596   : > { %v687_v28 = vadd.f32 %v682_v25, %v1338_v26  ;;  %v1168_v26 = vld [vmem:[%s1289_s28 + $0x58] sm:$0xff]  }
 0x597   : > { %v684_v29 = vpop.f32.mrf.mxu1  ;;  %1106 = vmatpush3.bf16.msra.mxu1 %v1168_v26 }
 0x598   : > { %v688_v30 = vsel %vm291_vm0, %v687_v28, 0.0  ;;  %1107 = vmatprep.subr.bf16.mxu1 %v1218_v9  ;;  %v1169_v9 = vld [vmem:[%s1289_s28 + $0x50] sm:$0xff]  }
 0x599   : > { %689 = vadd.xlane.f32.xlu0 %v688_v30  ;;  %v1096_v31 = vpop.f32.mrf.mxu1 }
 0x59b   : > { %1108 = vmatpush3.bf16.msra.mxu1 %v1169_v9 }
 0x5af   : > { %846 = vperm.xlu0 %1157, %v843_v52  }
 0x622   : > { %v690_v32 = vpop.xlane.xlu0 %689 }
 0x623   : > { %v691_v33 = vmul.f32 0.03125, %v690_v32 }
 0x625   : > { %v692_v34 = vsub.f32 %v687_v28, %v691_v33 }
 0x627   : > { %v693_v35 = vmul.f32 %v692_v34, %v692_v34 }
 0x629   : > { %v694_v36 = vsel %vm291_vm0, %v693_v35, 0.0 }
 0x62a   : > { %695 = vadd.xlane.f32.xlu1 %v694_v36  ;;  %v847_v1 = vpop.permute.xlu0 %846 }
 0x6b3   : > { %v696_v39 = vpop.xlane.xlu1 %695 }
 0x6b4   : > { %v697_v40 = vmul.f32 0.03125, %v696_v39 }
 0x6b6   : > { %v698_v41 = vadd.f32 1e-08, %v697_v40 }
 0x6b8   : > { %1176 = vrsqrt.f32 %v698_v41 }
 0x6c5   : > { %v1177_v45 = vpop.eup %1176 }
 0x6c6   : > { %v700_v46 = vmul.f32 %v1177_v45, %v692_v34 }
 0x6c8   : > { %v705_v48 = vmul.f32 %v704_v44, %v700_v46 }
 0x6ca   : > { %v710_v49 = vadd.f32 %v709_v47, %v705_v48 }
 0x6cc   : > { %v711_v50 = vpack.c.bf16 %v710_v49, %v710_v49 }
 0x6ce   : > { %1102 = vmatmul.mubr.msk.bf16.vlgmr.msra.gmra.mxu0 %vm291_vm0, %v711_v50 }
 0x78e   : > { %v770_v54 = vpop.f32.mrf.mxu0 }
 0x78f   : > { %v771_v55 = vadd.f32 %v770_v54, %v720_v19 }
 0x790   : > { %v1103_v56 = vpop.f32.mrf.mxu0 }
 0x791   : > { %v776_v57 = vmax.f32 %v771_v55, 0.0 }
 0x792   : > { %v773_v58 = vpop.f32.mrf.mxu0 }
 0x793   : > { %v777_v59 = vpack.c.bf16 %v776_v57, %v776_v57 }
 0x794   : > { %v1104_v60 = vpop.f32.mrf.mxu0 }
 0x795   : > { %1110 = vmatmul.mubr.msk.bf16.vlgmr.msra.gmra.mxu1 %vm291_vm0, %v777_v59 }
 0x855   : > { %v836_v62 = vpop.f32.mrf.mxu1 }
 0x856   : > { %v837_v63 = vadd.f32 %v836_v62, %v786_v61 }
 0x857   : > { %v1111_v0 = vpop.f32.mrf.mxu1 }
 0x858   : > { %v842_v2 = vadd.f32 %v837_v63, %v710_v49 }
 0x859   : > { %v839_v3 = vpop.f32.mrf.mxu1 }
 0x85a   : > { %v849_v18 = vmul.f32 %v847_v1, %v842_v2 }
 0x85b   : > { %v1112_v4 = vpop.f32.mrf.mxu1 }
 0x85c   : > { %v850_v5 = vpack.c.bf16 %v849_v18, %v849_v18 }
 0x85e   : > { %852 = vst.msk [vmem:[%s285_s16] sm:$0xf] %vm851_vm5, %v850_v5 }
 0x85f PF: > { %s14_s19 = sadd.s32 1, %s1216_s19   ;;  %s1430_s15 = smov %s1208_s17 }
 0x860   : > { %p11_p7 = scmp.ge.s32.totalorder %s14_s19, 8   ;;  %s1431_s16 = smov %s1212_s18 }
 0x861   : > { %s1432_s17 = smov %s1435_s20  ;;  %s1433_s18 = smov %s1439_s21 }
 0x862   :  { %13 = sbr.rel (!%p11_p7) target bundleno = 3 (0x3), region = 80 }

</bundles_post_ra>
